<compile_context>
chip_gen: v7x
topology: tpu7x:2x2x1
jax: 0.10.0
libtpu: 0.0.40
codegen_flags: <defaults>
</compile_context>

<pallas_src>
import jax
import jax.numpy as jnp
from jax.experimental import pallas as pl
from jax.experimental.pallas import tpu as pltpu


def _round_up(x, m):
    return ((x + m - 1) // m) * m


def _fnet_kernel(x_ref, w1_ref, b1_ref, w2_ref, b2_ref, out_ref):
    # h1 = tanh(x @ W1 + b1): MXU matmul with f32 accumulation, f32 bias add,
    # tanh on the EUP (own bundle slot).
    h1 = jnp.tanh(
        jnp.dot(x_ref[...], w1_ref[...], preferred_element_type=jnp.float32)
        + b1_ref[...]
    )
    # out = h1 @ W2 + b2
    out = (
        jnp.dot(h1.astype(w2_ref.dtype), w2_ref[...],
                preferred_element_type=jnp.float32)
        + b2_ref[...]
    )
    out_ref[...] = out.astype(out_ref.dtype)


def prepare_fnet_params(w1, b1, w2, b2, compute_dtype=None):
    """One-time param prep (call once, reuse across forwards).

    w1: (n_input, n_hidden1), b1: (n_hidden1,), w2: (n_hidden1, n_output),
    b2: (n_output,)  -- weights already in (in, out) layout.

    Pads only the hidden dim to a lane multiple (exact: padded hidden columns
    of W1 give tanh(0 + 0) = 0 and padded W2 rows contribute 0).  Biases are
    kept f32 as (1, n) rows; weights are optionally cast to `compute_dtype`
    (e.g. bf16) for MXU-native operands / halved HBM bytes.
    """
    n_in, n_hidden = w1.shape
    n_out = w2.shape[1]
    n_hid_p = _round_up(n_hidden, 128)
    wdt = compute_dtype if compute_dtype is not None else w1.dtype

    w1p = jnp.zeros((n_in, n_hid_p), wdt).at[:, :n_hidden].set(w1.astype(wdt))
    b1p = jnp.zeros((1, n_hid_p), jnp.float32).at[0, :n_hidden].set(
        b1.astype(jnp.float32))
    w2p = jnp.zeros((n_hid_p, n_out), wdt).at[:n_hidden, :].set(w2.astype(wdt))
    b2p = b2.astype(jnp.float32).reshape(1, n_out)
    return w1p, b1p, w2p, b2p


def fnet_forward(x, prepared_params, *, tm=1024, out_dtype=None):
    """x: (B, n_input); prepared_params from prepare_fnet_params()."""
    w1p, b1p, w2p, b2p = prepared_params
    B, n_in = x.shape
    n_hid_p = w1p.shape[1]
    n_out = w2p.shape[1]
    out_dtype = out_dtype if out_dtype is not None else x.dtype

    # Batch tile: multiple of 8 (sublane).  Small batches -> single tile.
    tm_eff = min(tm, _round_up(B, 8))
    # v7x: if everything fits in one step but the batch is non-trivial, split
    # into >=2 steps so ("parallel",) can shard across both TensorCores.
    if _round_up(B, tm_eff) == tm_eff and B > 8:
        tm_eff = _round_up(pl.cdiv(B, 2), 8)
    b_p = _round_up(B, tm_eff)
    grid = (b_p // tm_eff,)

    # MXU-native operand dtype (bf16 if params were prepared that way).
    xk = x.astype(w1p.dtype)
    if b_p != B:  # pad batch rows only (feature dim stays n_in).
        xk = jnp.zeros((b_p, n_in), xk.dtype).at[:B, :].set(xk)

    out = pl.pallas_call(
        _fnet_kernel,
        out_shape=jax.ShapeDtypeStruct((b_p, n_out), out_dtype),
        grid=grid,
        in_specs=[
            pl.BlockSpec((tm_eff, n_in), lambda i: (i, 0)),      # x tile (unpadded features)
            pl.BlockSpec((n_in, n_hid_p), lambda i: (0, 0)),     # W1 resident
            pl.BlockSpec((1, n_hid_p), lambda i: (0, 0)),        # b1 resident
            pl.BlockSpec((n_hid_p, n_out), lambda i: (0, 0)),    # W2 resident
            pl.BlockSpec((1, n_out), lambda i: (0, 0)),          # b2 resident
        ],
        out_specs=pl.BlockSpec((tm_eff, n_out), lambda i: (i, 0)),
        compiler_params=pltpu.CompilerParams(
            dimension_semantics=("parallel",),  # 2 TCs on v7x; no-op on v5e/v6e
        ),
    )(xk, w1p, b1p, w2p, b2p)

    return out[:B] if b_p != B else out


def init_fnet_params(key, n_input, n_hidden1, n_output, dtype=jnp.float32):
    """Deterministic init mirroring torch.nn.Linear's U(-1/sqrt(fan_in), 1/sqrt(fan_in))."""
    k1, k2, k3, k4 = jax.random.split(key, 4)
    bound1 = 1.0 / (n_input ** 0.5)
    bound2 = 1.0 / (n_hidden1 ** 0.5)
    w1 = jax.random.uniform(k1, (n_input, n_hidden1), dtype, -bound1, bound1)
    b1 = jax.random.uniform(k2, (n_hidden1,), dtype, -bound1, bound1)
    w2 = jax.random.uniform(k3, (n_hidden1, n_output), dtype, -bound2, bound2)
    b2 = jax.random.uniform(k4, (n_output,), dtype, -bound2, bound2)
    return w1, b1, w2, b2


if __name__ == "__main__":
    # Small shapes consistent with the module's forward (pure MLP on a state vector).
    batch, n_input, n_hidden1, n_output = 8, 6, 32, 4

    key = jax.random.PRNGKey(0)
    kx, kp, kb = jax.random.split(key, 3)
    x = jax.random.normal(kx, (batch, n_input), dtype=jnp.float32)
    w1, b1, w2, b2 = init_fnet_params(kp, n_input, n_hidden1, n_output)

    # Reference (same math as the PyTorch forward).
    ref_fn = lambda xx: jnp.tanh(xx @ w1 + b1) @ w2 + b2

    # One-time param prep (f32 path, exact vs. reference).
    params_f32 = prepare_fnet_params(w1, b1, w2, b2)

    out = jax.block_until_ready(fnet_forward(x, params_f32))
    assert out.shape == (batch, n_output)
    assert jnp.allclose(out, ref_fn(x), atol=1e-5, rtol=1e-5)

    # Larger batch: exercises the batch grid (>=2 pipelined steps, weights
    # resident across steps, megacore-shardable on v7x).
    x_big = jax.random.normal(kb, (512, n_input), dtype=jnp.float32)
    out_big = jax.block_until_ready(fnet_forward(x_big, params_f32))
    assert out_big.shape == (512, n_output)
    assert jnp.allclose(out_big, ref_fn(x_big), atol=1e-5, rtol=1e-5)

    # bf16 operand path (MXU-native, half the weight/x HBM bytes); relaxed tol.
    params_bf16 = prepare_fnet_params(w1, b1, w2, b2, compute_dtype=jnp.bfloat16)
    out_bf16 = jax.block_until_ready(
        fnet_forward(x_big, params_bf16, out_dtype=jnp.float32))
    assert out_bf16.shape == (512, n_output)
    assert jnp.allclose(out_bf16, ref_fn(x_big), atol=3e-2, rtol=3e-2)

    print("KERNEL_OK")
</pallas_src>

<mosaic_0001>
module attributes {stable_mosaic.version = 11 : i64} {
  func.func @_fnet_kernel(%arg0: i32, %arg1: memref<8x6xf32, #tpu.memory_space<vmem>>, %arg2: memref<6x128xf32, #tpu.memory_space<vmem>>, %arg3: memref<1x128xf32, #tpu.memory_space<vmem>>, %arg4: memref<128x4xf32, #tpu.memory_space<vmem>>, %arg5: memref<1x4xf32, #tpu.memory_space<vmem>>, %arg6: memref<8x4xf32, #tpu.memory_space<vmem>>) attributes {dimension_semantics = [#tpu.dimension_semantics<parallel>], iteration_bounds = array<i64: 1>, scalar_prefetch = 0 : i64, scratch_operands = 0 : i64, tpu.core_type = #tpu.core_type<tc>, window_params = [{transform_indices = @transform_0, window_bounds = array<i64: 8, 6>}, {pipeline_mode = #tpu.pipeline_mode<synchronous>, transform_indices = @transform_1, window_bounds = array<i64: 6, 128>}, {pipeline_mode = #tpu.pipeline_mode<synchronous>, transform_indices = @transform_2, window_bounds = array<i64: 1, 128>}, {pipeline_mode = #tpu.pipeline_mode<synchronous>, transform_indices = @transform_3, window_bounds = array<i64: 128, 4>}, {pipeline_mode = #tpu.pipeline_mode<synchronous>, transform_indices = @transform_4, window_bounds = array<i64: 1, 4>}, {transform_indices = @transform_5, window_bounds = array<i64: 8, 4>}]} {
    %c0 = arith.constant 0 : index
    %c0_0 = arith.constant 0 : index
    %0 = vector.load %arg1[%c0, %c0_0] : memref<8x6xf32, #tpu.memory_space<vmem>>, vector<8x6xf32>
    %c0_1 = arith.constant 0 : index
    %c0_2 = arith.constant 0 : index
    %1 = vector.load %arg2[%c0_1, %c0_2] : memref<6x128xf32, #tpu.memory_space<vmem>>, vector<6x128xf32>
    %cst = arith.constant dense<0.000000e+00> : vector<8x128xf32>
    %2 = tpu.matmul %0, %1, %cst {dimension_numbers = #tpu.dot_dimension_numbers<[1], [0], [0], [1], [0, 0, 1, 1], [], []>} : vector<8x6xf32>, vector<6x128xf32>, vector<8x128xf32> -> vector<8x128xf32>
    %c0_3 = arith.constant 0 : index
    %c0_4 = arith.constant 0 : index
    %3 = vector.load %arg3[%c0_3, %c0_4] : memref<1x128xf32, #tpu.memory_space<vmem>>, vector<1x128xf32>
    %4 = vector.broadcast %3 : vector<1x128xf32> to vector<8x128xf32>
    %5 = arith.addf %2, %4 : vector<8x128xf32>
    %6 = math.tanh %5 : vector<8x128xf32>
    %c0_5 = arith.constant 0 : index
    %c0_6 = arith.constant 0 : index
    %7 = vector.load %arg4[%c0_5, %c0_6] : memref<128x4xf32, #tpu.memory_space<vmem>>, vector<128x4xf32>
    %cst_7 = arith.constant dense<0.000000e+00> : vector<8x4xf32>
    %8 = tpu.matmul %6, %7, %cst_7 {dimension_numbers = #tpu.dot_dimension_numbers<[1], [0], [0], [1], [0, 0, 1, 1], [], []>} : vector<8x128xf32>, vector<128x4xf32>, vector<8x4xf32> -> vector<8x4xf32>
    %c0_8 = arith.constant 0 : index
    %c0_9 = arith.constant 0 : index
    %9 = vector.load %arg5[%c0_8, %c0_9] : memref<1x4xf32, #tpu.memory_space<vmem>>, vector<1x4xf32>
    %10 = vector.broadcast %9 : vector<1x4xf32> to vector<8x4xf32>
    %11 = arith.addf %8, %10 : vector<8x4xf32>
    %c0_10 = arith.constant 0 : index
    %c0_11 = arith.constant 0 : index
    %12 = vector.load %arg6[%c0_10, %c0_11] : memref<8x4xf32, #tpu.memory_space<vmem>>, vector<8x4xf32>
    tpu.vector_store %arg6[%c0_10, %c0_11], %11 {strides = array<i32>} : memref<8x4xf32, #tpu.memory_space<vmem>>, vector<8x4xf32>,
    return
  }
  func.func @transform_0(%arg0: i32) -> (i32, i32) {
    %c0_i32 = arith.constant 0 : i32
    %c0_i32_0 = arith.constant 0 : i32
    return %arg0, %c0_i32 : i32, i32
  }
  func.func @transform_1(%arg0: i32) -> (i32, i32) {
    %c0_i32 = arith.constant 0 : i32
    %c0_i32_0 = arith.constant 0 : i32
    %c0_i32_1 = arith.constant 0 : i32
    return %c0_i32, %c0_i32_0 : i32, i32
  }
  func.func @transform_2(%arg0: i32) -> (i32, i32) {
    %c0_i32 = arith.constant 0 : i32
    %c0_i32_0 = arith.constant 0 : i32
    %c0_i32_1 = arith.constant 0 : i32
    return %c0_i32, %c0_i32_0 : i32, i32
  }
  func.func @transform_3(%arg0: i32) -> (i32, i32) {
    %c0_i32 = arith.constant 0 : i32
    %c0_i32_0 = arith.constant 0 : i32
    %c0_i32_1 = arith.constant 0 : i32
    return %c0_i32, %c0_i32_0 : i32, i32
  }
  func.func @transform_4(%arg0: i32) -> (i32, i32) {
    %c0_i32 = arith.constant 0 : i32
    %c0_i32_0 = arith.constant 0 : i32
    %c0_i32_1 = arith.constant 0 : i32
    return %c0_i32, %c0_i32_0 : i32, i32
  }
  func.func @transform_5(%arg0: i32) -> (i32, i32) {
    %c0_i32 = arith.constant 0 : i32
    %c0_i32_0 = arith.constant 0 : i32
    return %arg0, %c0_i32 : i32, i32
  }
}

</mosaic_0001>

<bundles_post_ra>
// kernel: tpu_custom_call.1
= control target key start
LH: loop header
LB: loop body
LE: loop exit
PB: predicated region body
PF: predicated region fallthrough
CT: control target
= control target key end

     0   :  { %vm33_vm0 = vcmask 1045504   ;;  %vm29_vm1 = vcmask 48128   ;;  %v299_v0 = vmov 0.0   ;;  %vm300_vm2 = vmmov 0   ;;  %s395_s1 = inlined_call_operand.vmem [shape: f32[6,128], index: 1, kind: input, shape index: {}]   ;;  %s396_s0 = inlined_call_operand.vmem [shape: f32[8,6], index: 0, kind: input, shape index: {}]   ;;  %s397_s3 = inlined_call_operand.vmem [shape: f32[128,4], index: 3, kind: input, shape index: {}]   ;;  %s398_s2 = inlined_call_operand.vmem [shape: f32[1,128], index: 2, kind: input, shape index: {}]   ;;  %s399_s4 = inlined_call_operand.vmem [shape: f32[1,4], index: 4, kind: input, shape index: {}]   ;;  %s400_s5 = inlined_call_operand.vmem [shape: f32[8,4], index: 5, kind: output, shape index: {}]  }
   0x1   :  { %230 = vmatprep.subr.mxu0 %v299_v0  ;;  %v21_v1 = vld [vmem:[%s395_s1] sm:$0x3f]  ;;  %232 = vmatprep.mubr.msk.f32.mxu0 %vm300_vm2, %v299_v0  ;;  %v301_v4 = vmov 0.0|0.0   ;;  %v109_v5 = vld [vmem:[%s397_s3 + $0x8] sm:$0xff]  ;;  %v110_v6 = vld [vmem:[%s397_s3 + $0x10] sm:$0xff]  ;;  %vm201_vm3 = vcmask 31744  }
   0x2   :  { %v20_v2 = vld [vmem:[%s396_s0] sm:$0xff]  ;;  %231 = vmatpush3.msk.msra.mxu0 %vm33_vm0, %v21_v1  ;;  %270 = vmatprep.subr.bf16.mxu1 %v301_v4  ;;  %v111_v7 = vld [vmem:[%s397_s3 + $0x18] sm:$0xff]  ;;  %v113_v11 = vld [vmem:[%s397_s3 + $0x28] sm:$0xff] }
   0x3   :  { %v108_v3 = vld [vmem:[%s397_s3] sm:$0xff]  ;;  %233 = vmatmul.mubr.msk.f32.vlgmr.msra.gmra.mrb[0].mxu0 %vm29_vm1, %v20_v2  ;;  %267 = vmatprep.mubr.msk.f32.mxu1 %vm300_vm2, %v299_v0  ;;  %v274_v9 = vpack.c.bf16 %v111_v7, %v110_v6  ;;  %v114_v13 = vld [vmem:[%s397_s3 + $0x30] sm:$0xff]  ;;  %v115_v14 = vld [vmem:[%s397_s3 + $0x38] sm:$0xff] }
   0x4   :  { %v271_v8 = vpack.c.bf16 %v109_v5, %v108_v3  ;;  %v112_v10 = vld [vmem:[%s397_s3 + $0x20] sm:$0xff]  ;;  %v280_v15 = vpack.c.bf16 %v115_v14, %v114_v13  ;;  %v117_v17 = vld [vmem:[%s397_s3 + $0x48] sm:$0xff]  ;;  %v118_v19 = vld [vmem:[%s397_s3 + $0x50] sm:$0xff] }
   0x5   :  { %v277_v12 = vpack.c.bf16 %v113_v11, %v112_v10  ;;  %v116_v16 = vld [vmem:[%s397_s3 + $0x40] sm:$0xff]  ;;  %v119_v20 = vld [vmem:[%s397_s3 + $0x58] sm:$0xff]  ;;  %v121_v23 = vld [vmem:[%s397_s3 + $0x68] sm:$0xff] }
   0x6   :  { %272 = vmatpush3.bf16.msra.mxu1 %v271_v8  ;;  %v283_v18 = vpack.c.bf16 %v117_v17, %v116_v16  ;;  %v286_v21 = vpack.c.bf16 %v119_v20, %v118_v19  ;;  %v120_v22 = vld [vmem:[%s397_s3 + $0x60] sm:$0xff]  ;;  %v122_v25 = vld [vmem:[%s397_s3 + $0x70] sm:$0xff]  ;;  %v123_v26 = vld [vmem:[%s397_s3 + $0x78] sm:$0xff] }
   0x7   :  { %273 = vmatprep.subr.bf16.mxu1 %v301_v4  ;;  %v289_v24 = vpack.c.bf16 %v121_v23, %v120_v22  ;;  %v292_v27 = vpack.c.bf16 %v123_v26, %v122_v25  ;;  %v207_v28 = vld [vmem:[%s398_s2] ss:$0 sm:$0xff] }
   0x8   :  { %v210_v33 = vld [vmem:[%s399_s4] ss:$0 sm:$0xff] }
   0xa   :  { %275 = vmatpush3.bf16.msra.mxu1 %v274_v9 }
   0xb   :  { %276 = vmatprep.subr.bf16.mxu1 %v301_v4 }
   0xe   :  { %278 = vmatpush3.bf16.msra.mxu1 %v277_v12 }
   0xf   :  { %279 = vmatprep.subr.bf16.mxu1 %v301_v4 }
  0x12   :  { %281 = vmatpush3.bf16.msra.mxu1 %v280_v15 }
  0x13   :  { %282 = vmatprep.subr.bf16.mxu1 %v301_v4 }
  0x16   :  { %284 = vmatpush3.bf16.msra.mxu1 %v283_v18 }
  0x17   :  { %285 = vmatprep.subr.bf16.mxu1 %v301_v4 }
  0x1a   :  { %287 = vmatpush3.bf16.msra.mxu1 %v286_v21 }
  0x1b   :  { %288 = vmatprep.subr.bf16.mxu1 %v301_v4 }
  0x1e   :  { %290 = vmatpush3.bf16.msra.mxu1 %v289_v24 }
  0x1f   :  { %291 = vmatprep.subr.bf16.mxu1 %v301_v4 }
  0x22   :  { %293 = vmatpush3.bf16.msra.mxu1 %v292_v27 }
  0xd6   :  { %v103_v29 = vpop.f32.mrb[0].mxu0 }
  0xd7   :  { %v104_v30 = vadd.f32 %v207_v28, %v103_v29  ;;  %v234_v31 = vpop.f32.mrb[1].mxu0 }
  0xd9   :  { %297 = vtanh.f32 %v104_v30 }
  0xe3   :  { %v298_v32 = vpop.eup %297 }
  0xe4   :  { %268 = vmatmul.mubr.f32.vlgmr.msra.gmra.mrb[0].mxu1 %v298_v32 }
 0x1b7   :  { %v197_v34 = vpop.f32.mrb[0].mxu1 }
 0x1b8   :  { %v198_v35 = vadd.f32 %v210_v33, %v197_v34  ;;  %v269_v36 = vpop.f32.mrb[1].mxu1 }
 0x1ba   :  { %202 = vst.msk [vmem:[%s400_s5] sm:$0xff] %vm201_vm3, %v198_v35 }

</bundles_post_ra>
